<compile_context>
chip_gen: v7x
topology: tpu7x:2x2x1
jax: 0.10.0
libtpu: 0.0.40
codegen_flags: <defaults>
</compile_context>

<pallas_src>
import functools
import math

import jax
import jax.numpy as jnp
import numpy as np
from jax.experimental import pallas as pl
from jax.experimental.pallas import tpu as pltpu


def _round_up(x, m):
    return -(-x // m) * m


def _choose_batch_tile(B, Np, E, itemsize=4):
    """Pick the batch tile TB from a VMEM budget (safe for v7x's 64 MiB)."""
    # Per batch row: double-buffered K/V/LK stream blocks, the lane-padded
    # [*, Np, 1] inner-bias block, plus headroom for in-kernel f32 temporaries
    # of [TB, Np, E] shape (qk, pe, ...).
    per_row = (2 * 3 * Np * E + 2 * Np * 128 + 4 * Np * E) * itemsize
    budget = 32 * 1024 * 1024
    tb = max(1, budget // per_row)
    tb = int(min(tb, 128))
    if tb >= B:
        if B >= 16:  # keep >= 2 grid steps so both v7x TensorCores get work
            tb = _round_up(_round_up(B, 2) // 2, 8)
        else:
            tb = B
    else:
        tb = max(8, (tb // 8) * 8)  # sublane-aligned 2-D blocks when tiling
    return tb


def _vmem_limit_bytes(TB, Np, E, H, itemsize=4):
    streams = 2 * 3 * TB * Np * E * itemsize
    bias = 2 * TB * Np * 128 * itemsize        # [TB, Np, 1] is lane-padded in VMEM
    inter = 4 * TB * Np * E * itemsize         # in-kernel f32 temporaries
    small = (2 * TB * (E + 2 * Np) + E * E + 2 * E * H) * itemsize
    limit = int(1.3 * (streams + bias + inter + small)) + (4 << 20)
    return max(32 << 20, min(96 << 20, limit))


def _logit_attention_kernel(
    w_ref, sel_ref, selt_ref, q_ref, k_ref, v_ref, lk_ref, ibias_ref, lbias_ref,
    out_ref, *, num_heads, tanh_clipping, inv_softmax_temp, normalize,
):
    # Block shapes per grid step (TB batch rows):
    #   w_ref     [E, E]      (pre-transposed; glimpse = heads @ w)
    #   sel_ref   [E, H]      head-selector, pre-scaled by 1/sqrt(D)
    #   selt_ref  [H, E]      head-selector transpose (unscaled)
    #   q_ref     [TB, 1, E]
    #   k/v/lk    [TB, Np, E]
    #   ibias_ref [TB, Np, 1] additive inner-attention bias (-1e30 on masked)
    #   lbias_ref [TB, Np]    additive logits bias (-inf on masked)
    #   out_ref   [TB, Np]
    TB, Np, E = k_ref.shape
    H = num_heads
    f32 = jnp.float32

    # ---- 1. inner multi-head attention, all heads fused -------------------
    q = q_ref[...].astype(f32)                       # [TB, 1, E]
    k = k_ref[...].astype(f32)                       # [TB, Np, E]
    qk = q * k                                       # VPU, sublane broadcast
    # Per-head segment sums via one selector matmul (keeps full 128-lane vregs
    # instead of 2*H tiny M=1 MXU pushes + concat).  1/sqrt(D) is folded in.
    s = jnp.dot(qk.reshape(TB * Np, E), sel_ref[...],
                preferred_element_type=f32).reshape(TB, Np, H)
    s = s + ibias_ref[...]                           # masked keys -> -1e30 (NaN-safe)

    m = jnp.max(s, axis=1, keepdims=True)            # [TB, 1, H]
    p = jnp.exp(s - m)
    denom = jnp.sum(p, axis=1, keepdims=True)        # [TB, 1, H]
    p = p * pl.reciprocal(denom, approx=True)        # EUP slot, VALU-free

    # Expand per-head probs back across their D features, weight V, reduce N.
    pe = jnp.dot(p.reshape(TB * Np, H), selt_ref[...],
                 preferred_element_type=f32).reshape(TB, Np, E)
    v = v_ref[...].astype(f32)
    heads = jnp.sum(pe * v, axis=1)                  # [TB, E]

    # ---- 2. output projection: the one real MXU matmul (M = TB) ----------
    glimpse = jnp.dot(heads, w_ref[...].astype(f32), preferred_element_type=f32)

    # ---- 3. score against logit key (VPU multiply + lane reduce) ----------
    lk = lk_ref[...].astype(f32)                     # [TB, Np, E]
    logits = jnp.sum(glimpse[:, None, :] * lk, axis=-1) * (1.0 / math.sqrt(E))

    # ---- 4. tanh clip, mask, log-softmax -----------------------------------
    if tanh_clipping > 0:
        logits = jnp.tanh(logits) * tanh_clipping
    logits = logits + lbias_ref[...]                 # -inf on masked / padded nodes
    if normalize:
        logits = logits * inv_softmax_temp
        lmax = jnp.max(logits, axis=-1, keepdims=True)
        lse = lmax + jnp.log(jnp.sum(jnp.exp(logits - lmax), axis=-1, keepdims=True))
        logits = logits - lse
    out_ref[...] = logits.astype(out_ref.dtype)


def logit_attention(
    query, key, value, logit_key, mask, w_out, *, num_heads,
    tanh_clipping=10.0, mask_inner=True, mask_logits=True,
    normalize=True, softmax_temp=1.0,
):
    B, G, E = query.shape
    assert G == 1, "decoder query length must be 1"
    N = key.shape[1]
    H = num_heads
    assert E % H == 0
    D = E // H
    f32 = jnp.float32

    # ---- wrapper-side layout plumbing (plain JAX, fused by XLA) ------------
    Np = _round_up(max(N, 8), 8)            # sublane-aligned node count
    TB = _choose_batch_tile(B, Np, E)
    Bp = _round_up(B, TB)

    q3 = jnp.pad(query.astype(f32), ((0, Bp - B), (0, 0), (0, 0)))            # [Bp,1,E]
    k3 = jnp.pad(key.astype(f32), ((0, Bp - B), (0, Np - N), (0, 0)))         # [Bp,Np,E]
    v3 = jnp.pad(value.astype(f32), ((0, Bp - B), (0, Np - N), (0, 0)))
    lk3 = jnp.pad(jnp.squeeze(logit_key, axis=1).astype(f32),
                  ((0, Bp - B), (0, Np - N), (0, 0)))

    w_t = jnp.asarray(w_out, dtype=f32).T                                     # [E, E]

    head_id = jnp.arange(E) // D
    sel = (head_id[:, None] == jnp.arange(H)[None, :]).astype(f32)            # [E, H]
    sel_scaled = sel * (1.0 / math.sqrt(D))     # fold 1/sqrt(D) into the selector
    selt = sel.T                                                              # [H, E]

    mask_b = jnp.pad(mask.astype(jnp.bool_), ((0, Bp - B), (0, Np - N)))      # [Bp,Np]
    col_is_pad = (jnp.arange(Np) >= N)[None, :]
    zero = jnp.zeros_like(mask_b)
    inner_masked = jnp.logical_or(mask_b if mask_inner else zero, col_is_pad)
    logit_masked = jnp.logical_or(mask_b if mask_logits else zero, col_is_pad)
    # Additive biases: large-finite for the inner softmax (NaN-safe even if a
    # row is fully masked there), -inf for the final logits (matches the
    # reference's `logits[mask] = -inf`). Padded nodes are always masked.
    inner_bias = jnp.where(inner_masked, -1e30, 0.0).astype(f32)[:, :, None]  # [Bp,Np,1]
    logit_bias = jnp.where(logit_masked, -jnp.inf, 0.0).astype(f32)           # [Bp,Np]

    kernel = functools.partial(
        _logit_attention_kernel,
        num_heads=H,
        tanh_clipping=float(tanh_clipping),
        inv_softmax_temp=1.0 / float(softmax_temp),
        normalize=normalize,
    )

    # TODO(synk): for deployments with E < 128 (lane-sparse features) pack heads
    # along lanes / pad E in the caller; not done here.
    out = pl.pallas_call(
        kernel,
        out_shape=jax.ShapeDtypeStruct((Bp, Np), f32),
        grid=(Bp // TB,),
        in_specs=[
            pl.BlockSpec((E, E), lambda b: (0, 0)),          # W^T (shared)
            pl.BlockSpec((E, H), lambda b: (0, 0)),          # head selector (scaled)
            pl.BlockSpec((H, E), lambda b: (0, 0)),          # head selector^T
            pl.BlockSpec((TB, 1, E), lambda b: (b, 0, 0)),   # query
            pl.BlockSpec((TB, Np, E), lambda b: (b, 0, 0)),  # key
            pl.BlockSpec((TB, Np, E), lambda b: (b, 0, 0)),  # value
            pl.BlockSpec((TB, Np, E), lambda b: (b, 0, 0)),  # logit key
            pl.BlockSpec((TB, Np, 1), lambda b: (b, 0, 0)),  # inner-attention bias
            pl.BlockSpec((TB, Np), lambda b: (b, 0)),        # logits bias
        ],
        out_specs=pl.BlockSpec((TB, Np), lambda b: (b, 0)),  # lane-dense 2-D output
        compiler_params=pltpu.CompilerParams(
            dimension_semantics=("parallel",),
            vmem_limit_bytes=_vmem_limit_bytes(TB, Np, E, H),
        ),
    )(w_t, sel_scaled, selt, q3, k3, v3, lk3, inner_bias, logit_bias)

    return out[:B, :N]


def reference_logit_attention(
    query, key, value, logit_key, mask, w_out,
    *, num_heads, tanh_clipping=10.0, softmax_temp=1.0,
):
    """Pure-JAX reference mirroring the PyTorch module (defaults: all flags True)."""
    HI = jax.lax.Precision.HIGHEST
    B, G, E = query.shape
    D = E // num_heads

    def make_heads(x):  # '... g (h s) -> ... h g s'
        lead = x.shape[:-1]
        x = x.reshape(*lead, num_heads, D)
        return jnp.swapaxes(x, -3, -2)

    q = make_heads(query)   # [B, H, 1, D]
    k = make_heads(key)     # [B, H, N, D]
    v = make_heads(value)   # [B, H, N, D]

    bias = jnp.where(mask[:, None, None, :], -jnp.inf, 0.0)
    scores = jnp.einsum("bhgd,bhnd->bhgn", q, k, precision=HI) / math.sqrt(D) + bias
    p = jax.nn.softmax(scores, axis=-1)
    heads = jnp.einsum("bhgn,bhnd->bhgd", p, v, precision=HI)   # [B, H, 1, D]
    heads = jnp.swapaxes(heads, 1, 2).reshape(B, G, E)          # '... h n g -> ... n (h g)'

    glimpse = jnp.einsum("bge,fe->bgf", heads, w_out, precision=HI)  # Linear, no bias
    lk = jnp.squeeze(logit_key, axis=1)
    logits = jnp.einsum("bge,bne->bgn", glimpse, lk, precision=HI) / math.sqrt(E)
    logits = jnp.squeeze(logits, axis=1)

    if tanh_clipping > 0:
        logits = jnp.tanh(logits) * tanh_clipping
    logits = jnp.where(mask, -jnp.inf, logits)
    logits = jax.nn.log_softmax(logits / softmax_temp, axis=-1)
    return logits


if __name__ == "__main__":
    B, N, E, H = 2, 16, 32, 4

    key0 = jax.random.PRNGKey(0)
    kq, kk, kv, klk, kw, km = jax.random.split(key0, 6)

    query = jax.random.normal(kq, (B, 1, E), dtype=jnp.float32)
    key_ = jax.random.normal(kk, (B, N, E), dtype=jnp.float32)
    value = jax.random.normal(kv, (B, N, E), dtype=jnp.float32)
    logit_key = jax.random.normal(klk, (B, 1, N, E), dtype=jnp.float32)

    # nn.Linear(E, E, bias=False) weight, PyTorch-style uniform(-1/sqrt(E), 1/sqrt(E))
    bound = 1.0 / math.sqrt(E)
    w_out = jax.random.uniform(kw, (E, E), minval=-bound, maxval=bound, dtype=jnp.float32)

    mask = jax.random.bernoulli(km, p=0.3, shape=(B, N))
    mask = mask.at[:, 0].set(False)  # ensure at least one valid node per row

    out = logit_attention(
        query, key_, value, logit_key, mask, w_out,
        num_heads=H, tanh_clipping=10.0, mask_inner=True,
        mask_logits=True, normalize=True, softmax_temp=1.0,
    )
    out = jax.block_until_ready(out)

    # TODO(synk): the PyTorch in-forward NaN assert happens on host here (not in-kernel).
    assert not bool(jnp.isnan(out).any()), "Logits contain NaNs"

    ref = reference_logit_attention(
        query, key_, value, logit_key, mask, w_out,
        num_heads=H, tanh_clipping=10.0, softmax_temp=1.0,
    )
    # 5e-3 tolerance covers the EUP approx-reciprocal in the inner softmax.
    np.testing.assert_allclose(np.asarray(out), np.asarray(ref), rtol=5e-3, atol=5e-3)

    print("KERNEL_OK")
</pallas_src>

<mosaic_0001>
module attributes {stable_mosaic.version = 11 : i64} {
  func.func @_logit_attention_kernel(%arg0: i32, %arg1: memref<32x32xf32, #tpu.memory_space<vmem>>, %arg2: memref<32x4xf32, #tpu.memory_space<vmem>>, %arg3: memref<4x32xf32, #tpu.memory_space<vmem>>, %arg4: memref<2x1x32xf32, #tpu.memory_space<vmem>>, %arg5: memref<2x16x32xf32, #tpu.memory_space<vmem>>, %arg6: memref<2x16x32xf32, #tpu.memory_space<vmem>>, %arg7: memref<2x16x32xf32, #tpu.memory_space<vmem>>, %arg8: memref<2x16x1xf32, #tpu.memory_space<vmem>>, %arg9: memref<2x16xf32, #tpu.memory_space<vmem>>, %arg10: memref<2x16xf32, #tpu.memory_space<vmem>>) attributes {dimension_semantics = [#tpu.dimension_semantics<parallel>], iteration_bounds = array<i64: 1>, scalar_prefetch = 0 : i64, scratch_operands = 0 : i64, tpu.core_type = #tpu.core_type<tc>, window_params = [{pipeline_mode = #tpu.pipeline_mode<synchronous>, transform_indices = @transform_0, window_bounds = array<i64: 32, 32>}, {pipeline_mode = #tpu.pipeline_mode<synchronous>, transform_indices = @transform_1, window_bounds = array<i64: 32, 4>}, {pipeline_mode = #tpu.pipeline_mode<synchronous>, transform_indices = @transform_2, window_bounds = array<i64: 4, 32>}, {transform_indices = @transform_3, window_bounds = array<i64: 2, 1, 32>}, {transform_indices = @transform_4, window_bounds = array<i64: 2, 16, 32>}, {transform_indices = @transform_5, window_bounds = array<i64: 2, 16, 32>}, {transform_indices = @transform_6, window_bounds = array<i64: 2, 16, 32>}, {transform_indices = @transform_7, window_bounds = array<i64: 2, 16, 1>}, {transform_indices = @transform_8, window_bounds = array<i64: 2, 16>}, {transform_indices = @transform_9, window_bounds = array<i64: 2, 16>}]} {
    %c0 = arith.constant 0 : index
    %c0_0 = arith.constant 0 : index
    %c0_1 = arith.constant 0 : index
    %0 = vector.load %arg4[%c0, %c0_0, %c0_1] : memref<2x1x32xf32, #tpu.memory_space<vmem>>, vector<2x1x32xf32>
    %c0_2 = arith.constant 0 : index
    %c0_3 = arith.constant 0 : index
    %c0_4 = arith.constant 0 : index
    %1 = vector.load %arg5[%c0_2, %c0_3, %c0_4] : memref<2x16x32xf32, #tpu.memory_space<vmem>>, vector<2x16x32xf32>
    %2 = vector.broadcast %0 : vector<2x1x32xf32> to vector<2x16x32xf32>
    %3 = arith.mulf %2, %1 : vector<2x16x32xf32>
    %4 = vector.shape_cast %3 : vector<2x16x32xf32> to vector<32x32xf32>
    %c0_5 = arith.constant 0 : index
    %c0_6 = arith.constant 0 : index
    %5 = vector.load %arg2[%c0_5, %c0_6] : memref<32x4xf32, #tpu.memory_space<vmem>>, vector<32x4xf32>
    %cst = arith.constant dense<0.000000e+00> : vector<32x4xf32>
    %6 = tpu.matmul %4, %5, %cst {dimension_numbers = #tpu.dot_dimension_numbers<[1], [0], [0], [1], [0, 0, 1, 1], [], []>} : vector<32x32xf32>, vector<32x4xf32>, vector<32x4xf32> -> vector<32x4xf32>
    %7 = vector.shape_cast %6 : vector<32x4xf32> to vector<2x16x4xf32>
    %c0_7 = arith.constant 0 : index
    %c0_8 = arith.constant 0 : index
    %c0_9 = arith.constant 0 : index
    %8 = vector.load %arg8[%c0_7, %c0_8, %c0_9] : memref<2x16x1xf32, #tpu.memory_space<vmem>>, vector<2x16x1xf32>
    %9 = vector.broadcast %8 : vector<2x16x1xf32> to vector<2x16x4xf32>
    %10 = arith.addf %7, %9 : vector<2x16x4xf32>
    %cst_10 = arith.constant dense<0xFF800000> : vector<2x4xf32>
    %11 = vector.multi_reduction <maximumf>, %10, %cst_10 [1] : vector<2x16x4xf32> to vector<2x4xf32>
    %12 = vector.shape_cast %11 : vector<2x4xf32> to vector<2x1x4xf32>
    %13 = vector.broadcast %12 : vector<2x1x4xf32> to vector<2x16x4xf32>
    %14 = arith.subf %10, %13 : vector<2x16x4xf32>
    %15 = math.exp %14 : vector<2x16x4xf32>
    %cst_11 = arith.constant dense<0.000000e+00> : vector<2x4xf32>
    %16 = vector.multi_reduction <add>, %15, %cst_11 [1] : vector<2x16x4xf32> to vector<2x4xf32>
    %17 = vector.shape_cast %16 : vector<2x4xf32> to vector<2x1x4xf32>
    %18 = tpu.reciprocal %17 {approx = true} : vector<2x1x4xf32> -> vector<2x1x4xf32>
    %19 = vector.broadcast %18 : vector<2x1x4xf32> to vector<2x16x4xf32>
    %20 = arith.mulf %15, %19 : vector<2x16x4xf32>
    %21 = vector.shape_cast %20 : vector<2x16x4xf32> to vector<32x4xf32>
    %c0_12 = arith.constant 0 : index
    %c0_13 = arith.constant 0 : index
    %22 = vector.load %arg3[%c0_12, %c0_13] : memref<4x32xf32, #tpu.memory_space<vmem>>, vector<4x32xf32>
    %cst_14 = arith.constant dense<0.000000e+00> : vector<32x32xf32>
    %23 = tpu.matmul %21, %22, %cst_14 {dimension_numbers = #tpu.dot_dimension_numbers<[1], [0], [0], [1], [0, 0, 1, 1], [], []>} : vector<32x4xf32>, vector<4x32xf32>, vector<32x32xf32> -> vector<32x32xf32>
    %24 = vector.shape_cast %23 : vector<32x32xf32> to vector<2x16x32xf32>
    %c0_15 = arith.constant 0 : index
    %c0_16 = arith.constant 0 : index
    %c0_17 = arith.constant 0 : index
    %25 = vector.load %arg6[%c0_15, %c0_16, %c0_17] : memref<2x16x32xf32, #tpu.memory_space<vmem>>, vector<2x16x32xf32>
    %26 = arith.mulf %24, %25 : vector<2x16x32xf32>
    %cst_18 = arith.constant dense<0.000000e+00> : vector<2x32xf32>
    %27 = vector.multi_reduction <add>, %26, %cst_18 [1] : vector<2x16x32xf32> to vector<2x32xf32>
    %c0_19 = arith.constant 0 : index
    %c0_20 = arith.constant 0 : index
    %28 = vector.load %arg1[%c0_19, %c0_20] : memref<32x32xf32, #tpu.memory_space<vmem>>, vector<32x32xf32>
    %cst_21 = arith.constant dense<0.000000e+00> : vector<2x32xf32>
    %29 = tpu.matmul %27, %28, %cst_21 {dimension_numbers = #tpu.dot_dimension_numbers<[1], [0], [0], [1], [0, 0, 1, 1], [], []>} : vector<2x32xf32>, vector<32x32xf32>, vector<2x32xf32> -> vector<2x32xf32>
    %c0_22 = arith.constant 0 : index
    %c0_23 = arith.constant 0 : index
    %c0_24 = arith.constant 0 : index
    %30 = vector.load %arg7[%c0_22, %c0_23, %c0_24] : memref<2x16x32xf32, #tpu.memory_space<vmem>>, vector<2x16x32xf32>
    %31 = vector.shape_cast %29 : vector<2x32xf32> to vector<2x1x32xf32>
    %32 = vector.broadcast %31 : vector<2x1x32xf32> to vector<2x16x32xf32>
    %33 = arith.mulf %32, %30 : vector<2x16x32xf32>
    %cst_25 = arith.constant dense<0.000000e+00> : vector<2x16xf32>
    %34 = vector.multi_reduction <add>, %33, %cst_25 [2] : vector<2x16x32xf32> to vector<2x16xf32>
    %cst_26 = arith.constant 0.176776692 : f32
    %35 = vector.broadcast %cst_26 : f32 to vector<2x16xf32>
    %36 = arith.mulf %34, %35 : vector<2x16xf32>
    %37 = math.tanh %36 : vector<2x16xf32>
    %cst_27 = arith.constant 1.000000e+01 : f32
    %38 = vector.broadcast %cst_27 : f32 to vector<2x16xf32>
    %39 = arith.mulf %37, %38 : vector<2x16xf32>
    %c0_28 = arith.constant 0 : index
    %c0_29 = arith.constant 0 : index
    %40 = vector.load %arg9[%c0_28, %c0_29] : memref<2x16xf32, #tpu.memory_space<vmem>>, vector<2x16xf32>
    %41 = arith.addf %39, %40 : vector<2x16xf32>
    %cst_30 = arith.constant 1.000000e+00 : f32
    %42 = vector.broadcast %cst_30 : f32 to vector<2x16xf32>
    %43 = arith.mulf %41, %42 : vector<2x16xf32>
    %cst_31 = arith.constant dense<0xFF800000> : vector<2xf32>
    %44 = vector.multi_reduction <maximumf>, %43, %cst_31 [1] : vector<2x16xf32> to vector<2xf32>
    %45 = vector.shape_cast %44 : vector<2xf32> to vector<2x1xf32>
    %46 = vector.broadcast %45 : vector<2x1xf32> to vector<2x16xf32>
    %47 = arith.subf %43, %46 : vector<2x16xf32>
    %48 = math.exp %47 : vector<2x16xf32>
    %cst_32 = arith.constant dense<0.000000e+00> : vector<2xf32>
    %49 = vector.multi_reduction <add>, %48, %cst_32 [1] : vector<2x16xf32> to vector<2xf32>
    %50 = vector.shape_cast %49 : vector<2xf32> to vector<2x1xf32>
    %51 = math.log %50 : vector<2x1xf32>
    %52 = arith.addf %45, %51 : vector<2x1xf32>
    %53 = vector.broadcast %52 : vector<2x1xf32> to vector<2x16xf32>
    %54 = arith.subf %43, %53 : vector<2x16xf32>
    %c0_33 = arith.constant 0 : index
    %c0_34 = arith.constant 0 : index
    %55 = vector.load %arg10[%c0_33, %c0_34] : memref<2x16xf32, #tpu.memory_space<vmem>>, vector<2x16xf32>
    tpu.vector_store %arg10[%c0_33, %c0_34], %54 {strides = array<i32>} : memref<2x16xf32, #tpu.memory_space<vmem>>, vector<2x16xf32>,
    return
  }
  func.func @transform_0(%arg0: i32) -> (i32, i32) {
    %c0_i32 = arith.constant 0 : i32
    %c0_i32_0 = arith.constant 0 : i32
    %c0_i32_1 = arith.constant 0 : i32
    return %c0_i32, %c0_i32_0 : i32, i32
  }
  func.func @transform_1(%arg0: i32) -> (i32, i32) {
    %c0_i32 = arith.constant 0 : i32
    %c0_i32_0 = arith.constant 0 : i32
    %c0_i32_1 = arith.constant 0 : i32
    return %c0_i32, %c0_i32_0 : i32, i32
  }
  func.func @transform_2(%arg0: i32) -> (i32, i32) {
    %c0_i32 = arith.constant 0 : i32
    %c0_i32_0 = arith.constant 0 : i32
    %c0_i32_1 = arith.constant 0 : i32
    return %c0_i32, %c0_i32_0 : i32, i32
  }
  func.func @transform_3(%arg0: i32) -> (i32, i32, i32) {
    %c0_i32 = arith.constant 0 : i32
    %c0_i32_0 = arith.constant 0 : i32
    %c0_i32_1 = arith.constant 0 : i32
    return %arg0, %c0_i32, %c0_i32_0 : i32, i32, i32
  }
  func.func @transform_4(%arg0: i32) -> (i32, i32, i32) {
    %c0_i32 = arith.constant 0 : i32
    %c0_i32_0 = arith.constant 0 : i32
    %c0_i32_1 = arith.constant 0 : i32
    return %arg0, %c0_i32, %c0_i32_0 : i32, i32, i32
  }
  func.func @transform_5(%arg0: i32) -> (i32, i32, i32) {
    %c0_i32 = arith.constant 0 : i32
    %c0_i32_0 = arith.constant 0 : i32
    %c0_i32_1 = arith.constant 0 : i32
    return %arg0, %c0_i32, %c0_i32_0 : i32, i32, i32
  }
  func.func @transform_6(%arg0: i32) -> (i32, i32, i32) {
    %c0_i32 = arith.constant 0 : i32
    %c0_i32_0 = arith.constant 0 : i32
    %c0_i32_1 = arith.constant 0 : i32
    return %arg0, %c0_i32, %c0_i32_0 : i32, i32, i32
  }
  func.func @transform_7(%arg0: i32) -> (i32, i32, i32) {
    %c0_i32 = arith.constant 0 : i32
    %c0_i32_0 = arith.constant 0 : i32
    %c0_i32_1 = arith.constant 0 : i32
    return %arg0, %c0_i32, %c0_i32_0 : i32, i32, i32
  }
  func.func @transform_8(%arg0: i32) -> (i32, i32) {
    %c0_i32 = arith.constant 0 : i32
    %c0_i32_0 = arith.constant 0 : i32
    return %arg0, %c0_i32 : i32, i32
  }
  func.func @transform_9(%arg0: i32) -> (i32, i32) {
    %c0_i32 = arith.constant 0 : i32
    %c0_i32_0 = arith.constant 0 : i32
    return %arg0, %c0_i32 : i32, i32
  }
}

</mosaic_0001>

<bundles_post_ra>
// kernel: tpu_custom_call.1
= control target key start
LH: loop header
LB: loop body
LE: loop exit
PB: predicated region body
PF: predicated region fallthrough
CT: control target
= control target key end

     0   :  { %14 = vsyncpa [#allocation3], 0  ;;  %s1200_s0 = inlined_call_operand.vmem [shape: f32[32,32], index: 0, kind: input, shape index: {}]   ;;  %s1201_s1 = inlined_call_operand.vmem [shape: f32[32,4], index: 1, kind: input, shape index: {}]   ;;  %s1202_s2 = inlined_call_operand.vmem [shape: f32[4,32], index: 2, kind: input, shape index: {}]   ;;  %s1203_s3 = inlined_call_operand.vmem [shape: f32[2,1,32], index: 3, kind: input, shape index: {}]   ;;  %s1204_s4 = inlined_call_operand.vmem [shape: f32[2,16,32], index: 4, kind: input, shape index: {}]   ;;  %s1205_s5 = inlined_call_operand.hbm [shape: f32[2,16,32], index: 5, kind: input, shape index: {}]   ;;  %s1206_s6 = inlined_call_operand.hbm [shape: f32[2,16,32], index: 6, kind: input, shape index: {}]   ;;  %s1207_s7 = inlined_call_operand.vmem [shape: f32[2,16,1], index: 7, kind: input, shape index: {}]   ;;  %s1208_s8 = inlined_call_operand.vmem [shape: f32[2,16], index: 8, kind: input, shape index: {}]   ;;  %s1209_s9 = inlined_call_operand.hbm [shape: f32[2,16], index: 9, kind: output, shape index: {}]  }
   0x1   :  { %15 = vsyncpa [#allocation6], 0 }
   0x2   :  { %16 = vsyncpa [#allocation4], 0  ;;  %s941_s30 = smov [#allocation2]   ;;  %s869_s13 = scalar_lea.hbm %s1205_s5, 512 }
   0x3   :  { %s32_s10 = sshll.u32 %s941_s30, 4  ;;  %p870_p0 = scmp.ne.s32.totalorder %s1205_s5, %s869_s13  ;;  %s33_s10 = int_to_ptr.vmem [resolvable:$true] %s32_s10 }
   0x4   :  { %p873_p1 = scmp.lt.u32.totalorder %s869_s13, %s1205_s5 }
   0x6   :  { %p875_p2 = pnand %p873_p1, %p870_p0 }
   0x8   :  { %878 = shalt.err (!%p875_p2)
}
   0x9   :  { %s879_s18 = scalar_lea.vmem %s33_s10, 512  ;;  %p884_p4 = scmp.lt.s32.totalorder %s33_s10, %s33_s10 }
   0xa   :  { %p880_p3 = scmp.ne.s32.totalorder %s33_s10, %s879_s18  ;;  %p885_p5 = scmp.lt.s32.totalorder %s879_s18, %s879_s18 }
   0xc   :  { %p886_p6 = por %p885_p5, %p884_p4 }
   0xe   :  { %p887_p7 = pnand %p886_p6, %p880_p3 }
  0x10   :  { %890 = shalt.err (!%p887_p7)
}
  0x11   :  { %s942_s19 = smov 128   ;;  %s943_s20 = smov 8  }
  0x12   :  { %38 = dma.hbm_to_vmem [thread:$0]  %s1205_s5, 512, %s33_s10, [#allocation3], %s942_s19, %s942_s19, %s943_s20  }
  0x13   :  { %s944_s23 = smov [#allocation5]   ;;  %s891_s27 = scalar_lea.hbm %s1206_s6, 512 }
  0x14   :  { %s44_s24 = sshll.u32 %s944_s23, 4  ;;  %p892_p8 = scmp.ne.s32.totalorder %s1206_s6, %s891_s27  ;;  %s45_s24 = int_to_ptr.vmem [resolvable:$true] %s44_s24 }
  0x15   :  { %p895_p9 = scmp.lt.u32.totalorder %s891_s27, %s1206_s6 }
  0x17   :  { %p897_p10 = pnand %p895_p9, %p892_p8 }
  0x19   :  { %900 = shalt.err (!%p897_p10)
}
  0x1a   :  { %s901_s12 = scalar_lea.vmem %s45_s24, 512  ;;  %p906_p12 = scmp.lt.s32.totalorder %s45_s24, %s45_s24 }
  0x1b   :  { %p902_p11 = scmp.ne.s32.totalorder %s45_s24, %s901_s12  ;;  %p907_p13 = scmp.lt.s32.totalorder %s901_s12, %s901_s12 }
  0x1d   :  { %p908_p0 = por %p907_p13, %p906_p12 }
  0x1f   :  { %p909_p1 = pnand %p908_p0, %p902_p11 }
  0x21   :  { %912 = shalt.err (!%p909_p1)
}
  0x22   :  { %50 = dma.hbm_to_vmem [thread:$0]  %s1206_s6, 512, %s45_s24, [#allocation6], %s942_s19, %s942_s19, %s943_s20  }
  0x23   :  { %935 = dma.done.wait [#allocation3], 512  }
  0x24   :  { %936 = vsyncadd [#allocation3], 4294966784 }
  0x25   :  { %937 = dma.done.wait [#allocation6], 512  }
  0x26   :  { %938 = vsyncadd [#allocation6], 4294966784  ;;  %v945_v0 = vmov 0   ;;  %v83_v1 = vld [vmem:[%s1201_s1] sm:$0xff]  ;;  %v84_v2 = vld [vmem:[%s1201_s1 + $0x8] sm:$0xff]  ;;  %vm87_vm0 = vcmask 261120  }
  0x27   :  { %837 = vset.pattern.permute.xlu0 %v945_v0  ;;  %838 = vset.pattern.permute.xlu1 %v945_v0  ;;  %v85_v3 = vld [vmem:[%s1201_s1 + $0x10] sm:$0xff]  ;;  %v813_v4 = vpack.c.bf16 %v84_v2, %v83_v1  ;;  %v86_v5 = vld [vmem:[%s1201_s1 + $0x18] sm:$0xff]  ;;  %v750_v6 = vld [vmem:[%s1203_s3] ss:$0 sm:$0xff]  ;;  %vm281_vm1 = vcmask 1043456   ;;  %vm213_vm2 = vcmask 31744  }
  0x28   :  { %v63_v7 = vld [vmem:[%s1204_s4] sm:$0xff]  ;;  %v817_v8 = vpack.c.bf16 %v86_v5, %v85_v3  ;;  %v187_v11 = vld [vmem:[%s1207_s7 + $0x10] sm:$0xff]  ;;  %v64_v12 = vld [vmem:[%s1204_s4 + $0x8] sm:$0xff]  ;;  %vm947_vm3 = vmmov 0   ;;  %vm402_vm4 = vcmask 1041409   ;;  %vm600_vm5 = vcmask 130112  }
  0x29   :  { %v79_v9 = vmul.f32 %v750_v6, %v63_v7  ;;  %814 = vmatprep.subr.bf16.mxu0 %v813_v4  ;;  %v185_v10 = vld [vmem:[%s1207_s7] sm:$0xff]  ;;  %v65_v14 = vld [vmem:[%s1204_s4 + $0x10] sm:$0xff]  ;;  %201 = vperm.xlu1 %838, %v187_v11   ;;  %v186_v15 = vld [vmem:[%s1207_s7 + $0x8] sm:$0xff]  ;;  %v80_v16 = vmul.f32 %v750_v6, %v64_v12  ;;  %vm613_vm6 = vcmask 123904  }
  0x2a   :  { %816 = vmatpush3.bf16.msra.mxu0 %v813_v4  ;;  %v751_v13 = vld [vmem:[%s1203_s3 + $0x1] ss:$0 sm:$0xff]  ;;  %191 = vperm.xlu0 %837, %v185_v10   ;;  %v188_v17 = vld [vmem:[%s1207_s7 + $0x18] sm:$0xff] }
  0x2b   :  { %788 = vmatprep.mubr.msk.f32.mxu0 %vm87_vm0, %v79_v9  ;;  %818 = vmatprep.subr.bf16.mxu0 %v817_v8  ;;  %v81_v18 = vmul.f32 %v751_v13, %v65_v14  ;;  %v66_v19 = vld [vmem:[%s1204_s4 + $0x18] sm:$0xff]  ;;  %v268_v21 = vld [vmem:[%s1202_s2] sm:$0xf] }
  0x2c   :  { %v82_v20 = vmul.f32 %v751_v13, %v66_v19  ;;  %794 = vmatprep.subr.msk.mxu1 %vm281_vm1, %v268_v21 }
  0x2d   :  { %206 = vperm.xlu1 %838, %v188_v17   ;;  %795 = vmatpush3.msk.msra.mxu1 %vm281_vm1, %v268_v21 }
  0x2e   :  { %820 = vmatpush3.bf16.msra.mxu0 %v817_v8  ;;  %196 = vperm.xlu0 %837, %v186_v15  }
  0x31   :  { %789 = vmatmul.mubr.msk.f32.vlgmr.msra.gmra.mrb[0].mxu0 %vm87_vm0, %v80_v16 }
  0x32   :  { %791 = vmatprep.mubr.msk.f32.mxu0 %vm87_vm0, %v81_v18 }
  0x35   :  { %792 = vmatmul.mubr.msk.f32.gmra.mrb[2].mxu0 %vm87_vm0, %v82_v20 }
  0xa8   :  { %v202_v23 = vpop.permute.xlu1 %201 }
  0xa9   :  { %v192_v22 = vpop.permute.xlu0 %191 }
  0xac   :  { %v207_v30 = vpop.permute.xlu1 %206 }
  0xad   :  { %v197_v24 = vpop.permute.xlu0 %196 }
 0x104   :  { %v790_v25 = vpop.f32.mrb[0].mxu0 }
 0x105   :  { %v210_v26 = vadd.f32 %v790_v25, %v197_v24  ;;  %v166_v27 = vpop.f32.mrb[1].mxu0  ;;  %v396_v24 = vld [vmem:[%s1200_s0] sm:$0xff]  ;;  %v397_v25 = vld [vmem:[%s1200_s0 + $0x8] sm:$0xff] }
 0x106   :  { %v209_v28 = vadd.f32 %v192_v22, %v166_v27  ;;  %v946_v27 = vmov 0.0|0.0  }
 0x107   :  { %v215_v29 = vsel %vm213_vm2, %v210_v26, -inf  ;;  %821 = vmatprep.subr.bf16.mxu1 %v946_v27 }
 0x108   :  { %v214_v31 = vsel %vm213_vm2, %v209_v28, -inf  ;;  %v793_v32 = vpop.f32.mrb[2].mxu0 }
 0x109   :  { %v216_v33 = vmax.f32 %v214_v31, %v215_v29  ;;  %v212_v34 = vadd.f32 %v793_v32, %v207_v30  ;;  %v176_v35 = vpop.f32.mrb[3].mxu0  ;;  %v399_v29 = vld [vmem:[%s1200_s0 + $0x18] sm:$0xff]  ;;  %v948_v31 = vmov 0.0   ;;  %v484_v32 = vlaneseq }
 0x10a   :  { %v211_v36 = vadd.f32 %v202_v23, %v176_v35 }
 0x10b   :  { %v217_v37 = vrot.slane %v216_v33, 4  ;;  %v224_v38 = vsel %vm213_vm2, %v212_v34, -inf }
 0x10c   :  { %v223_v39 = vsel %vm213_vm2, %v211_v36, -inf }
 0x10d   :  { %v218_v40 = vmax.f32 %v216_v33, %v217_v37  ;;  %v225_v41 = vmax.f32 %v223_v39, %v224_v38  ;;  %v1099_v33 = vshrl.u32 %v484_v32, 7  ;;  %v371_v37 = vld [vmem:[#allocation2 + $0x8] sm:$0xff]  ;;  %v370_v38 = vld [vmem:[#allocation2] sm:$0xff] }
 0x10f   :  { %v219_v42 = vrot.slane %v218_v40, 2  ;;  %v226_v43 = vrot.slane %v225_v41, 4  ;;  %v1107_v35 = vsub.s32 0, %v1099_v33 }
 0x111   :  { %v220_v44 = vmax.f32 %v218_v40, %v219_v42  ;;  %v227_v45 = vmax.f32 %v225_v41, %v226_v43  ;;  %v373_v43 = vld [vmem:[#allocation2 + $0x18] sm:$0xff] }
 0x113   :  { %v221_v46 = vrot.slane %v220_v44, 1  ;;  %v228_v47 = vrot.slane %v227_v45, 2 }
 0x115   :  { %v222_v48 = vmax.f32 %v220_v44, %v221_v46  ;;  %v229_v49 = vmax.f32 %v227_v45, %v228_v47  ;;  %v372_v45 = vld [vmem:[#allocation2 + $0x10] sm:$0xff] }
 0x117   :  { %v232_v50 = vsub.f32 %v209_v28, %v222_v48  ;;  %v233_v51 = vsub.f32 %v210_v26, %v222_v48  ;;  %v230_v52 = vrot.slane %v229_v49, 1  ;;  %v822_v26 = vpack.c.bf16 %v397_v25, %v396_v24  ;;  %v398_v28 = vld [vmem:[%s1200_s0 + $0x10] sm:$0xff]  ;;  %v479_v24 = vld [vmem:[#allocation5 + $0x18] sm:$0xff]  ;;  %s950_s0 = smov [#allocation7]  }
 0x118   :  { %v825_v30 = vpack.c.bf16 %v399_v29, %v398_v28  ;;  %v1128_v28 = vsub.s32 1, %v1099_v33 }
 0x119   :  { %v236_v53 = vmul.f32 1.442695, %v232_v50  ;;  %v238_v54 = vmul.f32 1.442695, %v233_v51  ;;  %v231_v55 = vmax.f32 %v229_v49, %v230_v52 }
 0x11b   :  { %839 = vpow2.f32 %v236_v53  ;;  %v234_v56 = vsub.f32 %v211_v36, %v231_v55  ;;  %v235_v57 = vsub.f32 %v212_v34, %v231_v55  ;;  %v1104_v34 = vld [vmem:[%s1208_s8] sm:$0x3]  ;;  %s740_s8 = sshll.u32 %s950_s0, 4  ;;  %s741_s8 = int_to_ptr.vmem [resolvable:$true] %s740_s8 }
 0x11c   :  { %841 = vpow2.f32 %v238_v54  ;;  %v1111_v36 = vrot.slane %v1104_v34, %v1107_v35  ;;  %v557_v29 = vrot.slane %v1104_v34, %v1128_v28  ;;  %s913_s24 = scalar_lea.vmem %s741_s8, 32  ;;  %p918_p3 = scmp.lt.s32.totalorder %s741_s8, %s741_s8 }
 0x11d   :  { %v240_v58 = vmul.f32 1.442695, %v234_v56  ;;  %v242_v59 = vmul.f32 1.442695, %v235_v57  ;;  %p914_p2 = scmp.ne.s32.totalorder %s741_s8, %s913_s24  ;;  %p919_p4 = scmp.lt.s32.totalorder %s913_s24, %s913_s24 }
 0x11e   :  { %548 = vbcast.lane.b32.xlu1 %v1111_v36, 256 }
 0x11f   :  { %843 = vpow2.f32 %v240_v58  ;;  %p920_p5 = por %p919_p4, %p918_p3 }
 0x120   :  { %845 = vpow2.f32 %v242_v59 }
 0x121   :  { %p921_p6 = pnand %p920_p5, %p914_p2 }
 0x125   :  { %v840_v60 = vpop.eup %839 }
 0x126   :  { %v842_v61 = vpop.eup %841  ;;  %v244_v62 = vsel %vm213_vm2, %v840_v60, 0.0 }
 0x127   :  { %v245_v63 = vsel %vm213_vm2, %v842_v61, 0.0 }
 0x128   :  { %v246_v0 = vadd.f32 %v245_v63, %v244_v62 }
 0x129   :  { %v844_v1 = vpop.eup %843 }
 0x12a   :  { %v846_v2 = vpop.eup %845  ;;  %v247_v3 = vrot.slane %v246_v0, 4  ;;  %v253_v4 = vsel %vm213_vm2, %v844_v1, 0.0 }
 0x12b   :  { %v254_v5 = vsel %vm213_vm2, %v846_v2, 0.0 }
 0x12c   :  { %v255_v6 = vadd.f32 %v254_v5, %v253_v4  ;;  %v248_v7 = vadd.f32 %v247_v3, %v246_v0  ;;  %v949_v4 = vmov 1966171168  }
 0x12d   :  { %v482_v5 = vunpack.c.l.s4 %v949_v4 }
 0x12e   :  { %v256_v8 = vrot.slane %v255_v6, 4  ;;  %v249_v9 = vrot.slane %v248_v7, 2 }
 0x130   :  { %v257_v10 = vadd.f32 %v256_v8, %v255_v6  ;;  %v250_v11 = vadd.f32 %v249_v9, %v248_v7  ;;  %v483_v6 = vunpack.c.0.s8 %v482_v5 }
 0x132   :  { %v258_v12 = vrot.slane %v257_v10, 2  ;;  %v251_v13 = vrot.slane %v250_v11, 1  ;;  %v486_v7 = vsub.s32 %v483_v6, %v1099_v33 }
 0x134   :  { %v259_v14 = vadd.f32 %v258_v12, %v257_v10  ;;  %v252_v15 = vadd.f32 %v251_v13, %v250_v11  ;;  %v477_v13 = vld [vmem:[#allocation5 + $0x8] sm:$0xff] }
 0x136   :  { %847 = vrcp.f32 %v252_v15  ;;  %v260_v16 = vrot.slane %v259_v14, 1 }
 0x138   :  { %v261_v17 = vadd.f32 %v260_v16, %v259_v14  ;;  %v476_v14 = vld [vmem:[#allocation5] sm:$0xff] }
 0x13a   :  { %849 = vrcp.f32 %v261_v17  ;;  %v478_v17 = vld [vmem:[#allocation5 + $0x10] sm:$0xff] }
 0x140   :  { %v848_v18 = vpop.eup %847 }
 0x141   :  { %v264_v19 = vmul.f32 %v848_v18, %v840_v60  ;;  %v265_v20 = vmul.f32 %v848_v18, %v842_v61 }
 0x143   :  { %796 = vmatprep.mubr.msk.f32.mxu1 %vm213_vm2, %v264_v19 }
 0x144   :  { %v850_v21 = vpop.eup %849  ;;  %797 = vmatmul.mubr.msk.f32.vlgmr.msra.gmra.mrb[0].mxu1 %vm213_vm2, %v265_v20 }
 0x145   :  { %v266_v22 = vmul.f32 %v850_v21, %v844_v1  ;;  %v267_v23 = vmul.f32 %v850_v21, %v846_v2  ;;  %823 = vmatpush3.bf16.msra.mxu1 %v822_v26 }
 0x146   :  { %824 = vmatprep.subr.bf16.mxu1 %v946_v27 }
 0x147   :  { %799 = vmatprep.mubr.msk.f32.mxu1 %vm213_vm2, %v266_v22 }
 0x148   :  { %800 = vmatmul.mubr.msk.f32.gmra.mrb[2].mxu1 %vm213_vm2, %v267_v23 }
 0x149   :  { %826 = vmatpush3.bf16.msra.mxu1 %v825_v30  ;;  %810 = vmatprep.mubr.msk.f32.mxu1 %vm947_vm3, %v948_v31 }
 0x190   :  { %v549_v30 = vpop.permute.xlu1 %548 }
 0x217   :  { %v798_v39 = vpop.f32.mrb[0].mxu1 }
 0x218   :  { %v375_v40 = vmul.f32 %v798_v39, %v371_v37  ;;  %v351_v41 = vpop.f32.mrb[1].mxu1 }
 0x219   :  { %v374_v42 = vmul.f32 %v370_v38, %v351_v41 }
 0x21a   :  { %v379_v44 = vsel %vm87_vm0, %v375_v40, 0.0 }
 0x21b   :  { %v378_v46 = vsel %vm87_vm0, %v374_v42, 0.0  ;;  %v801_v47 = vpop.f32.mrb[2].mxu1 }
 0x21c   :  { %v380_v48 = vadd.f32 %v379_v44, %v378_v46  ;;  %v377_v49 = vmul.f32 %v801_v47, %v373_v43  ;;  %v361_v50 = vpop.f32.mrb[3].mxu1 }
 0x21d   :  { %v376_v51 = vmul.f32 %v372_v45, %v361_v50 }
 0x21e   :  { %v381_v52 = vrot.slane %v380_v48, 4  ;;  %v388_v53 = vsel %vm87_vm0, %v377_v49, 0.0 }
 0x21f   :  { %v387_v54 = vsel %vm87_vm0, %v376_v51, 0.0 }
 0x220   :  { %v382_v55 = vadd.f32 %v381_v52, %v380_v48  ;;  %v389_v56 = vadd.f32 %v388_v53, %v387_v54 }
 0x222   :  { %v383_v57 = vrot.slane %v382_v55, 2  ;;  %v390_v58 = vrot.slane %v389_v56, 4 }
 0x224   :  { %v384_v59 = vadd.f32 %v383_v57, %v382_v55  ;;  %v391_v60 = vadd.f32 %v390_v58, %v389_v56  ;;  %v590_v57 = vand.u32 127, %v484_v32 }
 0x226   :  { %v392_v61 = vrot.slane %v391_v60, 2  ;;  %v385_v62 = vrot.slane %v384_v59, 1  ;;  %v595_v58 = vadd.s32 4294967288, %v590_v57 }
 0x228   :  { %v393_v63 = vadd.f32 %v392_v61, %v391_v60  ;;  %v386_v1 = vadd.f32 %v385_v62, %v384_v59  ;;  %v1147_v60 = vsub.s32 %v595_v58, %v1099_v33  ;;  %v1150_v61 = vsub.s32 %v590_v57, %v1099_v33 }
 0x22a   :  { %v394_v0 = vrot.slane %v393_v63, 1 }
 0x22c   :  { %v395_v2 = vadd.f32 %v394_v0, %v393_v63 }
 0x22e   :  { %v403_v3 = vsel %vm402_vm4, %v395_v2, %v386_v1 }
 0x22f   :  { %811 = vmatmul.mubr.msk.f32.vlgmr.msra.gmra.mrb[4].mxu1 %vm87_vm0, %v403_v3 }
 0x302   :  { %v472_v8 = vpop.f32.mrb[4].mxu1 }
 0x303   :  { %v487_v9 = vrot.slane %v472_v8, %v486_v7  ;;  %v812_v10 = vpop.f32.mrb[5].mxu1 }
 0x305   :  { %v488_v11 = vcombine.high %v487_v9, %v487_v9  ;;  %v495_v12 = vrot.slane %v487_v9, %v486_v7 }
 0x307   :  { %v502_v15 = vrot.slane %v488_v11, %v486_v7  ;;  %v506_v16 = vrot.slane %v495_v12, %v1107_v35 }
 0x309   :  { %v514_v18 = vmul.f32 %v506_v16, %v477_v13  ;;  %v513_v19 = vmul.f32 %v506_v16, %v476_v14  ;;  %v510_v20 = vrot.slane %v502_v15, %v1107_v35 }
 0x30b   :  { %v520_v21 = vsel %vm87_vm0, %v514_v18, 0.0  ;;  %v517_v22 = vsel %vm87_vm0, %v513_v19, 0.0  ;;  %v515_v23 = vmul.f32 %v510_v20, %v478_v17  ;;  %v516_v26 = vmul.f32 %v510_v20, %v479_v24 }
 0x30c   :  { %521 = vadd.xlane.f32.xlu1 %v520_v21  ;;  %518 = vadd.xlane.f32.xlu0 %v517_v22 }
 0x30d   :  { %v523_v25 = vsel %vm87_vm0, %v515_v23, 0.0  ;;  %v526_v27 = vsel %vm87_vm0, %v516_v26, 0.0 }
 0x310   :  { %524 = vadd.xlane.f32.xlu0 %v523_v25 }
 0x314   :  { %527 = vadd.xlane.f32.xlu0 %v526_v27 }
 0x31d   :  { %559 = vbcast.lane.b32.xlu1 %v557_v29, 256 }
 0x321   :  { %563 = vbcast.lane.b32.xlu1 %v557_v29, 264 }
 0x32a   :  { %552 = vbcast.lane.b32.xlu0 %v1111_v36, 264 }
 0x399   :  { %v522_v31 = vpop.xlane.xlu1 %521  ;;  %v519_v37 = vpop.xlane.xlu0 %518 }
 0x39a   :  { %v530_v38 = vmul.f32 0.17677669, %v522_v31  ;;  %v529_v39 = vmul.f32 0.17677669, %v519_v37 }
 0x39c   :  { %851 = vtanh.f32 %v530_v38 }
 0x39d   :  { %853 = vtanh.f32 %v529_v39  ;;  %v525_v40 = vpop.xlane.xlu0 %524  ;;  %v560_v48 = vpop.permute.xlu1 %559 }
 0x39e   :  { %v531_v41 = vmul.f32 0.17677669, %v525_v40 }
 0x3a0   :  { %855 = vtanh.f32 %v531_v41 }
 0x3a1   :  { %v528_v42 = vpop.xlane.xlu0 %527  ;;  %v564_v54 = vpop.permute.xlu1 %563 }
 0x3a2   :  { %v532_v43 = vmul.f32 0.17677669, %v528_v42 }
 0x3a4   :  { %857 = vtanh.f32 %v532_v43 }
 0x3a5   :  { %v553_v45 = vpop.permute.xlu0 %552 }
 0x3a6   :  { %v852_v44 = vpop.eup %851 }
 0x3a7   :  { %v854_v34 = vpop.eup %853  ;;  %v538_v46 = vmul.f32 10.0, %v852_v44 }
 0x3a8   :  { %v537_v47 = vmul.f32 10.0, %v854_v34 }
 0x3a9   :  { %v1133_v36 = vadd.f32 %v553_v45, %v538_v46 }
 0x3aa   :  { %v856_v49 = vpop.eup %855  ;;  %v1135_v50 = vadd.f32 %v549_v30, %v537_v47 }
 0x3ab   :  { %581 = vperm.xlu1 %838, %v1133_v36   ;;  %v539_v51 = vmul.f32 10.0, %v856_v49 }
 0x3ac   :  { %578 = vperm.xlu0 %837, %v1135_v50  }
 0x3ad   :  { %v1139_v52 = vadd.f32 %v560_v48, %v539_v51 }
 0x3ae   :  { %v858_v53 = vpop.eup %857 }
 0x3af   :  { %v540_v55 = vmul.f32 10.0, %v858_v53 }
 0x3b0   :  { %584 = vperm.xlu0 %837, %v1139_v52  }
 0x3b1   :  { %v1142_v56 = vadd.f32 %v564_v54, %v540_v55 }
 0x3b3   :  { %587 = vperm.xlu1 %838, %v1142_v56  }
 0x42a   :  { %v582_v62 = vpop.permute.xlu1 %581 }
 0x42b   :  { %v579_v59 = vpop.permute.xlu0 %578  ;;  %v599_v0 = vrot.slane %v582_v62, %v1147_v60 }
 0x42c   :  { %v594_v1 = vrot.slane %v579_v59, %v1150_v61 }
 0x42e   :  { %v601_v4 = vsel %vm600_vm5, %v599_v0, %v594_v1 }
 0x42f   :  { %v585_v63 = vpop.permute.xlu0 %584 }
 0x430   :  { %v605_v3 = vrot.slane %v585_v63, %v1150_v61 }
 0x432   :  { %v588_v2 = vpop.permute.xlu1 %587 }
 0x433   :  { %v609_v32 = vrot.slane %v588_v2, %v1147_v60 }
 0x435   :  { %v610_v5 = vsel %vm600_vm5, %v609_v32, %v605_v3 }
 0x436   :  { %v611_v33 = vsel %vm402_vm4, %v610_v5, %v601_v4 }
 0x437   :  { %v614_v6 = vsel %vm613_vm6, %v611_v33, -inf }
 0x438   :  { %615 = vmax.xlane.f32.xlu0 %v614_v6 }
 0x4c5   :  { %v616_v7 = vpop.xlane.xlu0 %615 }
 0x4c6   :  { %v621_v8 = vrot.slane %v616_v7, %v1107_v35  ;;  %v625_v9 = vrot.slane %v616_v7, %v1128_v28 }
 0x4c8   :  { %v628_v10 = vsub.f32 %v1135_v50, %v621_v8  ;;  %v629_v11 = vsub.f32 %v1133_v36, %v621_v8  ;;  %v630_v13 = vsub.f32 %v1139_v52, %v625_v9  ;;  %v631_v15 = vsub.f32 %v1142_v56, %v625_v9 }
 0x4ca   :  { %v632_v12 = vmul.f32 1.442695, %v628_v10  ;;  %v634_v14 = vmul.f32 1.442695, %v629_v11  ;;  %v636_v16 = vmul.f32 1.442695, %v630_v13 }
 0x4cb   :  { %v638_v17 = vmul.f32 1.442695, %v631_v15 }
 0x4cc   :  { %859 = vpow2.f32 %v632_v12 }
 0x4cd   :  { %861 = vpow2.f32 %v634_v14 }
 0x4ce   :  { %863 = vpow2.f32 %v636_v16 }
 0x4cf   :  { %865 = vpow2.f32 %v638_v17 }
 0x4d6   :  { %v860_v18 = vpop.eup %859 }
 0x4d7   :  { %645 = vperm.xlu1 %838, %v860_v18   ;;  %v862_v19 = vpop.eup %861 }
 0x4d8   :  { %v864_v20 = vpop.eup %863 }
 0x4d9   :  { %v866_v21 = vpop.eup %865 }
 0x4db   :  { %648 = vperm.xlu1 %838, %v862_v19  }
 0x4df   :  { %651 = vperm.xlu1 %838, %v864_v20  }
 0x4e3   :  { %654 = vperm.xlu1 %838, %v866_v21  }
 0x556   :  { %v646_v22 = vpop.permute.xlu1 %645 }
 0x557   :  { %v659_v27 = vrot.slane %v646_v22, %v1150_v61 }
 0x55a   :  { %v649_v23 = vpop.permute.xlu1 %648 }
 0x55b   :  { %v663_v25 = vrot.slane %v649_v23, %v1147_v60 }
 0x55d   :  { %v664_v31 = vsel %vm600_vm5, %v663_v25, %v659_v27 }
 0x55e   :  { %v652_v24 = vpop.permute.xlu1 %651 }
 0x55f   :  { %v668_v29 = vrot.slane %v652_v24, %v1150_v61 }
 0x562   :  { %v655_v26 = vpop.permute.xlu1 %654 }
 0x563   :  { %v672_v30 = vrot.slane %v655_v26, %v1147_v60 }
 0x565   :  { %v673_v37 = vsel %vm600_vm5, %v672_v30, %v668_v29 }
 0x566   :  { %v674_v38 = vsel %vm402_vm4, %v673_v37, %v664_v31 }
 0x567   :  { %v676_v39 = vsel %vm613_vm6, %v674_v38, 0.0 }
 0x568   :  { %677 = vadd.xlane.f32.xlu1 %v676_v39 }
 0x5f5   :  { %v678_v40 = vpop.xlane.xlu1 %677 }
 0x5f6   :  { %867 = vlog2.f32 %v678_v40 }
 0x600   :  { %v868_v41 = vpop.eup %867 }
 0x601   :  { %v680_v42 = vmul.f32 0.6931472, %v868_v41 }
 0x603   :  { %v681_v43 = vadd.f32 %v680_v42, %v616_v7 }
 0x605   :  { %v686_v44 = vrot.slane %v681_v43, %v1107_v35  ;;  %v690_v46 = vrot.slane %v681_v43, %v1128_v28 }
 0x607   :  { %v694_v45 = vsub.f32 %v1133_v36, %v686_v44  ;;  %v693_v34 = vsub.f32 %v1135_v50, %v686_v44  ;;  %v695_v47 = vsub.f32 %v1139_v52, %v690_v46  ;;  %v696_v48 = vsub.f32 %v1142_v56, %v690_v46 }
 0x609   :  { %705 = vperm.xlu1 %838, %v694_v45   ;;  %702 = vperm.xlu0 %837, %v693_v34  }
 0x60d   :  { %708 = vperm.xlu0 %837, %v695_v47  }
 0x611   :  { %711 = vperm.xlu0 %837, %v696_v48  }
 0x688   :  { %v703_v49 = vpop.permute.xlu0 %702  ;;  %v706_v51 = vpop.permute.xlu1 %705 }
 0x689   :  { %v720_v54 = vrot.slane %v706_v51, %v1147_v60  ;;  %v716_v35 = vrot.slane %v703_v49, %v1150_v61 }
 0x68b   :  { %v721_v52 = vsel %vm600_vm5, %v720_v54, %v716_v35 }
 0x68c   :  { %v709_v53 = vpop.permute.xlu0 %708 }
 0x68d   :  { %v725_v28 = vrot.slane %v709_v53, %v1150_v61 }
 0x690   :  { %v712_v36 = vpop.permute.xlu0 %711 }
 0x691   :  { %v729_v50 = vrot.slane %v712_v36, %v1147_v60 }
 0x693   :  { %v730_v55 = vsel %vm600_vm5, %v729_v50, %v725_v28 }
 0x694   :  { %v731_v56 = vsel %vm402_vm4, %v730_v55, %v721_v52 }
 0x695   :  { %733 = vst.msk [vmem:[#allocation7] sm:$0x3] %vm613_vm6, %v731_v56 }
 0x696   :  { %924 = shalt.err (!%p921_p6)
}
 0x697   :  { %s925_s27 = scalar_lea.hbm %s1209_s9, 32 }
 0x698   :  { %p926_p7 = scmp.ne.s32.totalorder %s1209_s9, %s925_s27  ;;  %p929_p8 = scmp.lt.u32.totalorder %s925_s27, %s1209_s9 }
 0x69a   :  { %p931_p9 = pnand %p929_p8, %p926_p7 }
 0x69c   :  { %934 = shalt.err (!%p931_p9)
}
 0x69d   :  { %743 = dma.vmem_to_hbm [thread:$0]  %s741_s8, 32, %s1209_s9, [#allocation4]  }
 0x69e   :  { %939 = dma.done.wait [#allocation4], 32  }
 0x69f   :  { %940 = vsyncadd [#allocation4], 4294967264 }
 0x6a0   :  { %747 = vsyncpa [#allocation3], 1 }
 0x6a1   :  { %748 = vsyncpa [#allocation6], 1 }
 0x6a2   :  { %749 = vsyncpa [#allocation4], 1 }

</bundles_post_ra>
